<compile_context>
chip_gen: v5e
topology: v5e:2x2
jax: 0.10.0
libtpu: 0.0.40
codegen_flags: <defaults>
</compile_context>

<pallas_src>
import functools

import jax
import jax.numpy as jnp
from jax.experimental import pallas as pl
from jax.experimental.pallas import tpu as pltpu

_SUBLANE = 8


def _round_up(x, m):
    return ((x + m - 1) // m) * m


def _policy_kernel(x_ref, w1_ref, b1_ref, w2_ref, b2_ref, o_ref, *, compute_dtype):
    # x_ref : (tb, in_features)          activation tile, streams along the batch grid
    # w1_ref: (in_features, hidden)      VMEM-resident across the whole grid
    # b1_ref: (1, hidden)
    # w2_ref: (hidden, num_actions)      unpadded: num_actions is the full last dim
    # b2_ref: (1, num_actions)
    # o_ref : (tb, num_actions)          unpadded log-prob tile
    x = x_ref[...]
    w1 = w1_ref[...]
    w2 = w2_ref[...]
    if compute_dtype is not None:
        # bf16 MXU operands on v6e/v7x; accumulation stays f32 below.
        x = x.astype(compute_dtype)
        w1 = w1.astype(compute_dtype)
        w2 = w2.astype(compute_dtype)

    # linear1 + relu (MXU matmul, f32 accumulate; f32 VPU epilogue).
    h = jnp.dot(x, w1, preferred_element_type=jnp.float32)
    h = jnp.maximum(h + b1_ref[...].astype(jnp.float32), 0.0)
    if compute_dtype is not None:
        h = h.astype(compute_dtype)

    # linear2
    logits = jnp.dot(h, w2, preferred_element_type=jnp.float32)
    logits = logits + b2_ref[...].astype(jnp.float32)

    # Numerically stable log-softmax over the (unpadded) action axis.
    m = jnp.max(logits, axis=-1, keepdims=True)
    shifted = logits - m
    lse = jnp.log(jnp.sum(jnp.exp(shifted), axis=-1, keepdims=True))
    o_ref[...] = (shifted - lse).astype(o_ref.dtype)


def policy_network_forward_batched(
    states,
    w1,
    b1,
    w2,
    b2,
    *,
    max_block_b=1024,
    compute_dtype=None,
    out_dtype=jnp.float32,
    use_core_parallel=False,
):
    """Batched forward: states (B, ...) -> (B, num_actions) log-probabilities."""
    B = states.shape[0]
    in_features, hidden_size = w1.shape
    num_actions = w2.shape[1]

    x = states.reshape(B, in_features)
    b1r = b1.reshape(1, hidden_size)
    b2r = b2.reshape(1, num_actions)

    # Batch tile: multiple of 8 sublanes, capped at max_block_b. No wrapper
    # padding: a ragged last tile is handled by the pl.cdiv grid (out-of-bounds
    # rows are never written back, and garbage reads stay row-local).
    tb = min(max_block_b, _round_up(B, _SUBLANE))
    grid = (pl.cdiv(B, tb),)

    kernel = functools.partial(_policy_kernel, compute_dtype=compute_dtype)

    batch_sem = pltpu.CORE_PARALLEL if use_core_parallel else pltpu.PARALLEL

    out = pl.pallas_call(
        kernel,
        out_shape=jax.ShapeDtypeStruct((B, num_actions), out_dtype),
        grid_spec=pltpu.PrefetchScalarGridSpec(
            num_scalar_prefetch=0,
            grid=grid,
            in_specs=[
                # activations stream along the batch grid axis
                pl.BlockSpec((tb, in_features), lambda i: (i, 0)),
                # parameters: same (0, 0) block every step -> VMEM-resident
                pl.BlockSpec((in_features, hidden_size), lambda i: (0, 0)),
                pl.BlockSpec((1, hidden_size), lambda i: (0, 0)),
                pl.BlockSpec((hidden_size, num_actions), lambda i: (0, 0)),
                pl.BlockSpec((1, num_actions), lambda i: (0, 0)),
            ],
            out_specs=pl.BlockSpec((tb, num_actions), lambda i: (i, 0)),
        ),
        compiler_params=pltpu.CompilerParams(
            # batch axis is independent; set use_core_parallel=True on v7x to
            # force the 2-TensorCore split.
            dimension_semantics=(batch_sem,),
        ),
    )(x, w1, b1r, w2, b2r)

    return out


def policy_network_forward(state, w1, b1, w2, b2, **kwargs):
    """Single-state forward matching PolicyNetwork.forward.

    state: any shape; flattened like state.view(-1).
    Returns: (num_actions,) log-probabilities.
    """
    in_features = w1.shape[0]
    out = policy_network_forward_batched(
        state.reshape(1, in_features), w1, b1, w2, b2, **kwargs)
    return out[0]


def _reference_forward_batched(states, w1, b1, w2, b2):
    x = states.reshape(states.shape[0], -1).astype(jnp.float32)
    h = jnp.maximum(x @ w1 + b1, 0.0)
    logits = h @ w2 + b2
    return jax.nn.log_softmax(logits, axis=-1)


if __name__ == "__main__":
    # Shapes consistent with the module: flattened state of 32 features,
    # hidden_size=32, num_actions=8; small demo batches (8 and a ragged 13).
    in_features = 32
    hidden_size = 32
    num_actions = 8
    batch = 8
    ragged_batch = 13  # exercises the partial-last-tile path (no wrapper pad)

    key = jax.random.PRNGKey(0)
    k_state, k_batch, k_rag, k_w1, k_b1, k_w2, k_b2 = jax.random.split(key, 7)

    # Single state arrives as a (4, 8) observation and is flattened inside forward.
    state = jax.random.normal(k_state, (4, 8), dtype=jnp.float32)
    states = jax.random.normal(k_batch, (batch, 4, 8), dtype=jnp.float32)
    states_ragged = jax.random.normal(k_rag, (ragged_batch, 4, 8), dtype=jnp.float32)

    # Deterministic parameter init (uniform, roughly nn.Linear scale).
    bound1 = 1.0 / jnp.sqrt(in_features)
    bound2 = 1.0 / jnp.sqrt(hidden_size)
    w1 = jax.random.uniform(k_w1, (in_features, hidden_size), jnp.float32, -bound1, bound1)
    b1 = jax.random.uniform(k_b1, (hidden_size,), jnp.float32, -bound1, bound1)
    w2 = jax.random.uniform(k_w2, (hidden_size, num_actions), jnp.float32, -bound2, bound2)
    b2 = jax.random.uniform(k_b2, (num_actions,), jnp.float32, -bound2, bound2)

    # Single-state path (exact module semantics).
    out1 = jax.block_until_ready(policy_network_forward(state, w1, b1, w2, b2))
    ref1 = _reference_forward_batched(state.reshape(1, -1), w1, b1, w2, b2)[0]
    assert out1.shape == (num_actions,)
    assert jnp.allclose(out1, ref1, atol=1e-5, rtol=1e-5), "single-state mismatch"

    # Batched path (throughput path; amortizes launch/DMA overhead).
    outB = jax.block_until_ready(
        policy_network_forward_batched(states, w1, b1, w2, b2))
    refB = _reference_forward_batched(states, w1, b1, w2, b2)
    assert outB.shape == (batch, num_actions)
    assert jnp.allclose(outB, refB, atol=1e-5, rtol=1e-5), "batched mismatch"

    # Ragged batch (B not a multiple of the 8-row sublane tile): no wrapper pad.
    outR = jax.block_until_ready(
        policy_network_forward_batched(states_ragged, w1, b1, w2, b2))
    refR = _reference_forward_batched(states_ragged, w1, b1, w2, b2)
    assert outR.shape == (ragged_batch, num_actions)
    assert jnp.allclose(outR, refR, atol=1e-5, rtol=1e-5), "ragged-batch mismatch"

    print("KERNEL_OK")
</pallas_src>

<mosaic_0001>
module attributes {stable_mosaic.version = 11 : i64} {
  func.func @_policy_kernel(%arg0: i32, %arg1: memref<8x32xf32, #tpu.memory_space<vmem>>, %arg2: memref<32x32xf32, #tpu.memory_space<vmem>>, %arg3: memref<1x32xf32, #tpu.memory_space<vmem>>, %arg4: memref<32x8xf32, #tpu.memory_space<vmem>>, %arg5: memref<1x8xf32, #tpu.memory_space<vmem>>, %arg6: memref<8x8xf32, #tpu.memory_space<vmem>>) attributes {dimension_semantics = [#tpu.dimension_semantics<parallel>], iteration_bounds = array<i64: 1>, scalar_prefetch = 0 : i64, scratch_operands = 0 : i64, tpu.core_type = #tpu.core_type<tc>, window_params = [{transform_indices = @transform_0, window_bounds = array<i64: 8, 32>}, {pipeline_mode = #tpu.pipeline_mode<synchronous>, transform_indices = @transform_1, window_bounds = array<i64: 32, 32>}, {pipeline_mode = #tpu.pipeline_mode<synchronous>, transform_indices = @transform_2, window_bounds = array<i64: 1, 32>}, {pipeline_mode = #tpu.pipeline_mode<synchronous>, transform_indices = @transform_3, window_bounds = array<i64: 32, 8>}, {pipeline_mode = #tpu.pipeline_mode<synchronous>, transform_indices = @transform_4, window_bounds = array<i64: 1, 8>}, {transform_indices = @transform_5, window_bounds = array<i64: 8, 8>}]} {
    %c0 = arith.constant 0 : index
    %c0_0 = arith.constant 0 : index
    %0 = vector.load %arg1[%c0, %c0_0] : memref<8x32xf32, #tpu.memory_space<vmem>>, vector<8x32xf32>
    %c0_1 = arith.constant 0 : index
    %c0_2 = arith.constant 0 : index
    %1 = vector.load %arg2[%c0_1, %c0_2] : memref<32x32xf32, #tpu.memory_space<vmem>>, vector<32x32xf32>
    %c0_3 = arith.constant 0 : index
    %c0_4 = arith.constant 0 : index
    %2 = vector.load %arg4[%c0_3, %c0_4] : memref<32x8xf32, #tpu.memory_space<vmem>>, vector<32x8xf32>
    %cst = arith.constant dense<0.000000e+00> : vector<8x32xf32>
    %3 = tpu.matmul %0, %1, %cst {dimension_numbers = #tpu.dot_dimension_numbers<[1], [0], [0], [1], [0, 0, 1, 1], [], []>} : vector<8x32xf32>, vector<32x32xf32>, vector<8x32xf32> -> vector<8x32xf32>
    %c0_5 = arith.constant 0 : index
    %c0_6 = arith.constant 0 : index
    %4 = vector.load %arg3[%c0_5, %c0_6] : memref<1x32xf32, #tpu.memory_space<vmem>>, vector<1x32xf32>
    %5 = vector.broadcast %4 : vector<1x32xf32> to vector<8x32xf32>
    %6 = arith.addf %3, %5 : vector<8x32xf32>
    %cst_7 = arith.constant 0.000000e+00 : f32
    %7 = vector.broadcast %cst_7 : f32 to vector<8x32xf32>
    %8 = arith.maximumf %6, %7 : vector<8x32xf32>
    %cst_8 = arith.constant dense<0.000000e+00> : vector<8x8xf32>
    %9 = tpu.matmul %8, %2, %cst_8 {dimension_numbers = #tpu.dot_dimension_numbers<[1], [0], [0], [1], [0, 0, 1, 1], [], []>} : vector<8x32xf32>, vector<32x8xf32>, vector<8x8xf32> -> vector<8x8xf32>
    %c0_9 = arith.constant 0 : index
    %c0_10 = arith.constant 0 : index
    %10 = vector.load %arg5[%c0_9, %c0_10] : memref<1x8xf32, #tpu.memory_space<vmem>>, vector<1x8xf32>
    %11 = vector.broadcast %10 : vector<1x8xf32> to vector<8x8xf32>
    %12 = arith.addf %9, %11 : vector<8x8xf32>
    %cst_11 = arith.constant dense<0xFF800000> : vector<8xf32>
    %13 = vector.multi_reduction <maximumf>, %12, %cst_11 [1] : vector<8x8xf32> to vector<8xf32>
    %14 = vector.shape_cast %13 : vector<8xf32> to vector<8x1xf32>
    %15 = vector.broadcast %14 : vector<8x1xf32> to vector<8x8xf32>
    %16 = arith.subf %12, %15 : vector<8x8xf32>
    %17 = math.exp %16 : vector<8x8xf32>
    %cst_12 = arith.constant dense<0.000000e+00> : vector<8xf32>
    %18 = vector.multi_reduction <add>, %17, %cst_12 [1] : vector<8x8xf32> to vector<8xf32>
    %19 = vector.shape_cast %18 : vector<8xf32> to vector<8x1xf32>
    %20 = math.log %19 : vector<8x1xf32>
    %21 = vector.broadcast %20 : vector<8x1xf32> to vector<8x8xf32>
    %22 = arith.subf %16, %21 : vector<8x8xf32>
    %c0_13 = arith.constant 0 : index
    %c0_14 = arith.constant 0 : index
    %23 = vector.load %arg6[%c0_13, %c0_14] : memref<8x8xf32, #tpu.memory_space<vmem>>, vector<8x8xf32>
    tpu.vector_store %arg6[%c0_13, %c0_14], %22 {strides = array<i32>} : memref<8x8xf32, #tpu.memory_space<vmem>>, vector<8x8xf32>,
    return
  }
  func.func @transform_0(%arg0: i32) -> (i32, i32) {
    %c0_i32 = arith.constant 0 : i32
    %c0_i32_0 = arith.constant 0 : i32
    return %arg0, %c0_i32 : i32, i32
  }
  func.func @transform_1(%arg0: i32) -> (i32, i32) {
    %c0_i32 = arith.constant 0 : i32
    %c0_i32_0 = arith.constant 0 : i32
    %c0_i32_1 = arith.constant 0 : i32
    return %c0_i32, %c0_i32_0 : i32, i32
  }
  func.func @transform_2(%arg0: i32) -> (i32, i32) {
    %c0_i32 = arith.constant 0 : i32
    %c0_i32_0 = arith.constant 0 : i32
    %c0_i32_1 = arith.constant 0 : i32
    return %c0_i32, %c0_i32_0 : i32, i32
  }
  func.func @transform_3(%arg0: i32) -> (i32, i32) {
    %c0_i32 = arith.constant 0 : i32
    %c0_i32_0 = arith.constant 0 : i32
    %c0_i32_1 = arith.constant 0 : i32
    return %c0_i32, %c0_i32_0 : i32, i32
  }
  func.func @transform_4(%arg0: i32) -> (i32, i32) {
    %c0_i32 = arith.constant 0 : i32
    %c0_i32_0 = arith.constant 0 : i32
    %c0_i32_1 = arith.constant 0 : i32
    return %c0_i32, %c0_i32_0 : i32, i32
  }
  func.func @transform_5(%arg0: i32) -> (i32, i32) {
    %c0_i32 = arith.constant 0 : i32
    %c0_i32_0 = arith.constant 0 : i32
    return %arg0, %c0_i32 : i32, i32
  }
}

</mosaic_0001>

<bundles_post_ra>
// kernel: tpu_custom_call.1
= control target key start
LH: loop header
LB: loop body
LE: loop exit
PB: predicated region body
PF: predicated region fallthrough
CT: control target
= control target key end

     0   :  { %10 = vsyncpa [#allocation3], 0  ;;  %vm34_vm0 = vcmask 261120   ;;  %vm86_vm1 = vcmask 64512   ;;  %s227_s0 = inlined_call_operand.vmem [shape: f32[1,32], index: 0, kind: input, shape index: {}]   ;;  %s228_s1 = inlined_call_operand.vmem [shape: f32[32,32], index: 1, kind: input, shape index: {}]   ;;  %s229_s2 = inlined_call_operand.vmem [shape: f32[1,32], index: 2, kind: input, shape index: {}]   ;;  %s230_s3 = inlined_call_operand.vmem [shape: f32[32,8], index: 3, kind: input, shape index: {}]   ;;  %s231_s4 = inlined_call_operand.vmem [shape: f32[1,8], index: 4, kind: input, shape index: {}]   ;;  %s232_s5 = inlined_call_operand.hbm [shape: f32[1,8], index: 5, kind: output, shape index: {}]  }
   0x1   :  { %v25_v0 = vld [vmem:[%s228_s1 + $0x18] sm:$0xff]  ;;  %v24_v1 = vld [vmem:[%s228_s1 + $0x10] sm:$0xff]  ;;  %v23_v2 = vld [vmem:[%s228_s1 + $0x8] sm:$0xff] }
   0x2   :  { %50 = vmatpush.msra.mxu0 %v25_v0  ;;  %v29_v3 = vld [vmem:[%s230_s3 + $0x18] sm:$0xff]  ;;  %v22_v4 = vld [vmem:[%s228_s1] sm:$0xff]  ;;  %v28_v6 = vld [vmem:[%s230_s3 + $0x10] sm:$0xff] }
   0x3   :  { %78 = vmatpush.msra.mxu1 %v29_v3  ;;  %v21_v5 = vld [vmem:[%s227_s0] sm:$0xff]  ;;  %v27_v7 = vld [vmem:[%s230_s3 + $0x8] sm:$0xff] }
   0x4   :  { %51 = vmatpush.msra.mxu0 %v24_v1  ;;  %v26_v8 = vld [vmem:[%s230_s3] sm:$0xff] }
   0x5   :  { %79 = vmatpush.msra.mxu1 %v28_v6  ;;  %v123_v9 = vld [vmem:[%s229_s2] ss:$0 sm:$0xff] }
   0x6   :  { %52 = vmatpush.msra.mxu0 %v23_v2  ;;  %v124_v13 = vld [vmem:[%s231_s4] ss:$0 sm:$0xff] }
   0x7   :  { %80 = vmatpush.msra.mxu1 %v27_v7 }
   0x8   :  { %53 = vmatpush.msra.mxu0 %v22_v4 }
   0x9   :  { %118 = vmatmul.msk.f32.vlgmr.msra.gmra.mxu0 %vm34_vm0, %v21_v5  ;;  %81 = vmatpush.msra.mxu1 %v26_v8 }
  0x86   :  { %v55_v10 = vpop.f32.mrf.mxu0 }
  0x87   :  { %v56_v11 = vadd.f32 %v123_v9, %v55_v10 }
  0x89   :  { %v58_v12 = vmax.f32 %v56_v11, 0.0 }
  0x8b   :  { %119 = vmatmul.msk.f32.vlgmr.msra.gmra.mxu1 %vm34_vm0, %v58_v12 }
 0x108   :  { %v83_v14 = vpop.f32.mrf.mxu1 }
 0x109   :  { %v84_v15 = vadd.f32 %v124_v13, %v83_v14 }
 0x10b   :  { %v87_v16 = vsel %vm86_vm1, %v84_v15, -inf }
 0x10c   :  { %88 = vmax.xlane.f32.xlu0 %v87_v16 }
 0x17f   :  { %v89_v17 = vpop.xlane.xlu0 %88 }
 0x180   :  { %v90_v18 = vsub.f32 %v84_v15, %v89_v17 }
 0x182   :  { %v91_v19 = vmul.f32 1.442695, %v90_v18 }
 0x184   :  { %125 = vpow2.f32 %v91_v19 }
 0x18a   :  { %v126_v20 = vpop.eup %125 }
 0x18b   :  { %v93_v21 = vsel %vm86_vm1, %v126_v20, 0.0 }
 0x18c   :  { %94 = vadd.xlane.f32.xlu0 %v93_v21 }
 0x1ff   :  { %v95_v22 = vpop.xlane.xlu0 %94 }
 0x200   :  { %127 = vlog2.f32 %v95_v22 }
 0x206   :  { %v128_v23 = vpop.eup %127 }
 0x207   :  { %v97_v24 = vmul.f32 0.6931472, %v128_v23 }
 0x209   :  { %v98_v25 = vsub.f32 %v90_v18, %v97_v24 }
 0x20b   :  { %99 = vst.msk [vmem:[#allocation2] sm:$0xff] %vm86_vm1, %v98_v25 }
 0x20c   :  { %103 = vsyncadd [#allocation3], 112  ;;  %s106_s4 = sshll.u32 %s232_s5, 4  ;;  %s155_s13 = smov [#allocation2]   ;;  %s107_s4 = int_to_ptr.hbm [resolvable:$true] %s106_s4 }
 0x20d   :  { %s104_s14 = sshll.u32 %s155_s13, 4  ;;  %s156_s15 = smov 16   ;;  %s105_s14 = int_to_ptr.vmem [resolvable:$true] %s104_s14 }
 0x20e   :  { %s157_s16 = smov 1  }
 0x20f   :  { %112 = dma.vmem_to_hbm [thread:$0]  %s105_s14, 16, %s107_s4, [#allocation3], %s156_s15, %s156_s15, %s157_s16  }
 0x210   :  { %153 = dma.done.wait [#allocation3], 128  }
 0x211   :  { %154 = vsyncadd [#allocation3], 4294967168 }
 0x212   :  { %117 = vsyncpa [#allocation3], 1 }

</bundles_post_ra>
